<compile_context>
chip_gen: v5e
topology: v5e:2x2
jax: 0.10.0
libtpu: 0.0.40
codegen_flags: <defaults>
</compile_context>

<pallas_src>
import functools
import math

import jax
import jax.numpy as jnp
from jax.experimental import pallas as pl
from jax.experimental.pallas import tpu as pltpu


_LANE = 128
_MAX_TILE = 512                       # row / reduction tile for the tiled path
_TILED_VMEM_LIMIT = 32 * 1024 * 1024  # per-step tiles are a few MiB; safe everywhere


def _round_up(n, m):
    return ((n + m - 1) // m) * m


def _pad2d(a, rows, cols):
    r, c = a.shape
    if r == rows and c == cols:
        return a
    return jnp.pad(a, ((0, rows - r), (0, cols - c)))


def _tile_and_pad(dim, max_tile=_MAX_TILE):
    """Pad `dim` to a lane-dense size and pick its tile.

    Narrow dims (<= max_tile) are padded only to 128 and tiled with the full
    padded width (grid axis collapses to 1).  Wide dims are padded to a
    multiple of max_tile and tiled with max_tile.
    """
    dp = _round_up(dim, _LANE)
    if dp <= max_tile:
        return dp, dp
    return _round_up(dp, max_tile), max_tile


def _vmem_capacity_bytes():
    try:
        return int(pltpu.get_tpu_info().vmem_capacity_bytes)
    except Exception:
        return 64 * 1024 * 1024   # conservative fallback (v7x-sized)


def _fused_budgets():
    """Generation-aware (budget, vmem_limit) for the fused single-call path."""
    cap = _vmem_capacity_bytes()
    if cap >= 96 * 1024 * 1024:
        # v5e / v6e: 128 MiB physical VMEM, single TensorCore -> fuse aggressively.
        return 80 * 1024 * 1024, 100 * 1024 * 1024
    # v7x: 64 MiB physical VMEM and 2 TCs -> prefer the (megacore-sharded)
    # tiled path for medium graphs; keep fused only for genuinely small ones.
    return 20 * 1024 * 1024, 44 * 1024 * 1024


# --------------------- fused small-graph kernel (one call) -------------------

def _fused_gcn_kernel(x_ref, adj_ref, w1_ref, b1_ref, w2_ref, b2_ref, o_ref,
                      *, use_relu):
    adj = adj_ref[...]
    # Layer 1: h = relu(adj @ (x @ W1) + b1)
    s1 = jnp.dot(x_ref[...], w1_ref[...], preferred_element_type=jnp.float32)
    h = jnp.dot(adj, s1.astype(jnp.bfloat16),
                preferred_element_type=jnp.float32) + b1_ref[...]
    if use_relu:
        h = jnp.maximum(h, 0.0)
    # (dropout is identity in inference mode)
    # Layer 2: out = adj @ (h @ W2) + b2
    s2 = jnp.dot(h.astype(jnp.bfloat16), w2_ref[...],
                 preferred_element_type=jnp.float32)
    out = jnp.dot(adj, s2.astype(jnp.bfloat16),
                  preferred_element_type=jnp.float32) + b2_ref[...]
    o_ref[...] = out.astype(o_ref.dtype)


def _gcn_fused(x, adj, w1, b1, w2, b2, *, use_relu, vmem_limit):
    n, f = x.shape
    h_dim = w1.shape[1]
    c = w2.shape[1]
    np_, fp, hp, cp = (_round_up(d, _LANE) for d in (n, f, h_dim, c))

    xb = _pad2d(x, np_, fp).astype(jnp.bfloat16)
    adjb = _pad2d(adj, np_, np_).astype(jnp.bfloat16)
    w1b = _pad2d(w1, fp, hp).astype(jnp.bfloat16)
    w2b = _pad2d(w2, hp, cp).astype(jnp.bfloat16)
    b1p = _pad2d(b1, 1, hp).astype(jnp.float32)
    b2p = _pad2d(b2, 1, cp).astype(jnp.float32)

    kernel = functools.partial(_fused_gcn_kernel, use_relu=use_relu)
    out = pl.pallas_call(
        kernel,
        out_shape=jax.ShapeDtypeStruct((np_, cp), jnp.float32),
        in_specs=[
            pl.BlockSpec((np_, fp), lambda: (0, 0)),
            pl.BlockSpec((np_, np_), lambda: (0, 0)),
            pl.BlockSpec((fp, hp), lambda: (0, 0)),
            pl.BlockSpec((1, hp), lambda: (0, 0)),
            pl.BlockSpec((hp, cp), lambda: (0, 0)),
            pl.BlockSpec((1, cp), lambda: (0, 0)),
        ],
        out_specs=pl.BlockSpec((np_, cp), lambda: (0, 0)),
        compiler_params=pltpu.CompilerParams(vmem_limit_bytes=vmem_limit),
    )(xb, adjb, w1b, b1p, w2b, b2p)
    return out[:n, :c]


# ----------------------- tiled large-graph kernels ---------------------------

def _matmul_kernel(a_ref, b_ref, o_ref, acc_ref):
    @pl.when(pl.program_id(2) == 0)
    def _():
        acc_ref[...] = jnp.zeros_like(acc_ref)

    acc_ref[...] += jnp.dot(a_ref[...], b_ref[...],
                            preferred_element_type=jnp.float32)

    @pl.when(pl.program_id(2) == pl.num_programs(2) - 1)
    def _():
        o_ref[...] = acc_ref[...].astype(o_ref.dtype)


def _matmul_bias_act_kernel(a_ref, b_ref, bias_ref, o_ref, acc_ref, *,
                            apply_relu):
    @pl.when(pl.program_id(2) == 0)
    def _():
        acc_ref[...] = jnp.zeros_like(acc_ref)

    acc_ref[...] += jnp.dot(a_ref[...], b_ref[...],
                            preferred_element_type=jnp.float32)

    @pl.when(pl.program_id(2) == pl.num_programs(2) - 1)
    def _():
        out = acc_ref[...] + bias_ref[...]
        if apply_relu:
            out = jnp.maximum(out, 0.0)
        o_ref[...] = out.astype(o_ref.dtype)


def _matmul_cost(m, n, k, a, b, out_dtype):
    bytes_accessed = (a.size * a.dtype.itemsize + b.size * b.dtype.itemsize
                      + m * n * jnp.dtype(out_dtype).itemsize)
    return pl.CostEstimate(flops=2 * m * n * k, transcendentals=0,
                           bytes_accessed=int(bytes_accessed))


def _tiled_matmul(a, b, *, out_dtype, tm, tn, tk):
    m, k = a.shape
    _, n = b.shape
    grid = (m // tm, n // tn, k // tk)
    return pl.pallas_call(
        _matmul_kernel,
        out_shape=jax.ShapeDtypeStruct((m, n), out_dtype),
        grid_spec=pltpu.PrefetchScalarGridSpec(
            num_scalar_prefetch=0,
            grid=grid,
            in_specs=[
                pl.BlockSpec((tm, tk), lambda i, j, kk: (i, kk)),
                pl.BlockSpec((tk, tn), lambda i, j, kk: (kk, j)),
            ],
            out_specs=pl.BlockSpec((tm, tn), lambda i, j, kk: (i, j)),
            scratch_shapes=[pltpu.VMEM((tm, tn), jnp.float32)],
        ),
        compiler_params=pltpu.CompilerParams(
            dimension_semantics=("parallel", "parallel", "arbitrary"),
            vmem_limit_bytes=_TILED_VMEM_LIMIT),
        cost_estimate=_matmul_cost(m, n, k, a, b, out_dtype),
    )(a, b)


def _tiled_matmul_bias_act(a, b, bias, *, apply_relu, out_dtype, tm, tn, tk):
    m, k = a.shape
    _, n = b.shape
    grid = (m // tm, n // tn, k // tk)
    kernel = functools.partial(_matmul_bias_act_kernel, apply_relu=apply_relu)
    return pl.pallas_call(
        kernel,
        out_shape=jax.ShapeDtypeStruct((m, n), out_dtype),
        grid_spec=pltpu.PrefetchScalarGridSpec(
            num_scalar_prefetch=0,
            grid=grid,
            in_specs=[
                pl.BlockSpec((tm, tk), lambda i, j, kk: (i, kk)),
                pl.BlockSpec((tk, tn), lambda i, j, kk: (kk, j)),
                pl.BlockSpec((1, tn), lambda i, j, kk: (0, j)),
            ],
            out_specs=pl.BlockSpec((tm, tn), lambda i, j, kk: (i, j)),
            scratch_shapes=[pltpu.VMEM((tm, tn), jnp.float32)],
        ),
        compiler_params=pltpu.CompilerParams(
            dimension_semantics=("parallel", "parallel", "arbitrary"),
            vmem_limit_bytes=_TILED_VMEM_LIMIT),
        cost_estimate=_matmul_cost(m, n, k, a, b, out_dtype),
    )(a, b, bias)


def _gcn_tiled(x, adj, w1, b1, w2, b2, *, use_relu, max_tile=_MAX_TILE):
    n, f = x.shape
    h_dim = w1.shape[1]
    c = w2.shape[1]

    # Narrow dims pad only to 128 and use the full padded width as the column
    # tile (j axis == 1 -> adj blocks fetched once per (i,k)); the node dim
    # uses 512-wide row/reduction tiles when large.
    np_, t_n = _tile_and_pad(n, max_tile)
    fp, t_f = _tile_and_pad(f, max_tile)
    hp, t_h = _tile_and_pad(h_dim, max_tile)
    cp, t_c = _tile_and_pad(c, max_tile)

    xb = _pad2d(x, np_, fp).astype(jnp.bfloat16)
    adjb = _pad2d(adj, np_, np_).astype(jnp.bfloat16)
    w1b = _pad2d(w1, fp, hp).astype(jnp.bfloat16)
    w2b = _pad2d(w2, hp, cp).astype(jnp.bfloat16)
    b1p = _pad2d(b1, 1, hp).astype(jnp.float32)
    b2p = _pad2d(b2, 1, cp).astype(jnp.float32)

    # Layer 1: support = X @ W1 ; h = relu(adj @ support + b1)
    s1 = _tiled_matmul(xb, w1b, out_dtype=jnp.bfloat16, tm=t_n, tn=t_h, tk=t_f)
    h = _tiled_matmul_bias_act(adjb, s1, b1p, apply_relu=use_relu,
                               out_dtype=jnp.bfloat16, tm=t_n, tn=t_h, tk=t_n)
    # (dropout is identity in inference mode)
    # Layer 2: support = h @ W2 ; out = adj @ support + b2
    s2 = _tiled_matmul(h, w2b, out_dtype=jnp.bfloat16, tm=t_n, tn=t_c, tk=t_h)
    out = _tiled_matmul_bias_act(adjb, s2, b2p, apply_relu=False,
                                 out_dtype=jnp.float32, tm=t_n, tn=t_c, tk=t_n)
    return out[:n, :c]


# ------------------------------ public API -----------------------------------

def init_graph_conv_params(key, in_features, out_features):
    """Matches GraphConvolution.reset_parameters: U(-stdv, stdv), stdv=1/sqrt(out)."""
    stdv = 1.0 / math.sqrt(out_features)
    kw, kb = jax.random.split(key)
    w = jax.random.uniform(kw, (in_features, out_features),
                           minval=-stdv, maxval=stdv, dtype=jnp.float32)
    b = jax.random.uniform(kb, (1, out_features),
                           minval=-stdv, maxval=stdv, dtype=jnp.float32)
    return w, b


def _fused_vmem_estimate(np_, fp, hp, cp):
    # Conservative: assumes Pallas double-buffers the (grid-less) in/out blocks
    # and counts the dominant in-kernel intermediates.
    bf16_inputs = 2 * (np_ * fp + np_ * np_ + fp * hp + hp * cp)
    f32_output = 4 * np_ * cp
    intermediates = 4 * np_ * hp + 2 * np_ * hp + 4 * np_ * cp + 2 * np_ * cp
    return 2 * (bf16_inputs + f32_output) + intermediates


def gcn_forward(x, adj, params, *, use_relu=True, dropout=0.5,
                force_tiled=False, max_tile=_MAX_TILE):
    """Two-layer GCN forward (inference mode)."""
    # TODO(synk): F.dropout with training=True not implemented; in inference
    # mode (training=False) dropout is the identity, which is what we compute.
    del dropout
    (w1, b1), (w2, b2) = params
    x = x.astype(jnp.float32)
    adj = adj.astype(jnp.float32)

    n, f = x.shape
    h_dim = w1.shape[1]
    c = w2.shape[1]
    np_, fp, hp, cp = (_round_up(d, _LANE) for d in (n, f, h_dim, c))

    budget, limit = _fused_budgets()
    if (not force_tiled
            and _fused_vmem_estimate(np_, fp, hp, cp) <= budget):
        return _gcn_fused(x, adj, w1, b1, w2, b2, use_relu=use_relu,
                          vmem_limit=limit)
    return _gcn_tiled(x, adj, w1, b1, w2, b2, use_relu=use_relu,
                      max_tile=max_tile)


if __name__ == "__main__":
    key = jax.random.PRNGKey(0)

    def make_problem(k, n, nfeat, nhid, nclass):
        kx, kadj, k1, k2 = jax.random.split(k, 4)
        x = jax.random.normal(kx, (n, nfeat), dtype=jnp.float32)
        a = (jax.random.uniform(kadj, (n, n)) > 0.6).astype(jnp.float32)
        a = jnp.maximum(a, a.T) + jnp.eye(n, dtype=jnp.float32)
        adj = a / jnp.sum(a, axis=1, keepdims=True)
        params = (init_graph_conv_params(k1, nfeat, nhid),
                  init_graph_conv_params(k2, nhid, nclass))
        return x, adj, params

    def reference(x, adj, params, use_relu=True):
        (w1, b1), (w2, b2) = params
        h = adj @ (x @ w1) + b1
        if use_relu:
            h = jnp.maximum(h, 0.0)
        return adj @ (h @ w2) + b2

    k_small, k_big = jax.random.split(key)

    # 1) Small graph: N=8 nodes, nfeat=16, nhid=32, nclass=8 -> fused single kernel.
    x, adj, params = make_problem(k_small, 8, 16, 32, 8)
    out = jax.block_until_ready(gcn_forward(x, adj, params, use_relu=True))
    ref = reference(x, adj, params, use_relu=True)
    assert out.shape == (8, 8)
    assert jnp.allclose(out, ref, atol=5e-2, rtol=5e-2), \
        f"fused path mismatch: max err {jnp.max(jnp.abs(out - ref))}"

    # 2) Exercise the tiled two-pass path with a real multi-step grid
    #    (max_tile=128 so the 256-node dim gives 2 row tiles / 2 k steps;
    #    nhid/nclass stay un-split -> single column tile as designed).
    x2, adj2, params2 = make_problem(k_big, 256, 192, 128, 16)
    out2 = jax.block_until_ready(
        gcn_forward(x2, adj2, params2, use_relu=True, force_tiled=True,
                    max_tile=128))
    ref2 = reference(x2, adj2, params2, use_relu=True)
    assert out2.shape == (256, 16)
    assert jnp.allclose(out2, ref2, atol=5e-2, rtol=5e-2), \
        f"tiled path mismatch: max err {jnp.max(jnp.abs(out2 - ref2))}"

    print("KERNEL_OK")
</pallas_src>

<mosaic_0001>
module attributes {stable_mosaic.version = 11 : i64} {
  func.func @_fused_gcn_kernel(%arg0: memref<128x128xbf16, #tpu.memory_space<vmem>>, %arg1: memref<128x128xbf16, #tpu.memory_space<vmem>>, %arg2: memref<128x128xbf16, #tpu.memory_space<vmem>>, %arg3: memref<1x128xf32, #tpu.memory_space<vmem>>, %arg4: memref<128x128xbf16, #tpu.memory_space<vmem>>, %arg5: memref<1x128xf32, #tpu.memory_space<vmem>>, %arg6: memref<128x128xf32, #tpu.memory_space<vmem>>) attributes {dimension_semantics = [], scalar_prefetch = 0 : i64, scratch_operands = 0 : i64, tpu.core_type = #tpu.core_type<tc>} {
    %c0 = arith.constant 0 : index
    %c0_0 = arith.constant 0 : index
    %0 = vector.load %arg1[%c0, %c0_0] : memref<128x128xbf16, #tpu.memory_space<vmem>>, vector<128x128xbf16>
    %c0_1 = arith.constant 0 : index
    %c0_2 = arith.constant 0 : index
    %1 = vector.load %arg0[%c0_1, %c0_2] : memref<128x128xbf16, #tpu.memory_space<vmem>>, vector<128x128xbf16>
    %c0_3 = arith.constant 0 : index
    %c0_4 = arith.constant 0 : index
    %2 = vector.load %arg2[%c0_3, %c0_4] : memref<128x128xbf16, #tpu.memory_space<vmem>>, vector<128x128xbf16>
    %cst = arith.constant dense<0.000000e+00> : vector<128x128xf32>
    %3 = tpu.matmul %1, %2, %cst {dimension_numbers = #tpu.dot_dimension_numbers<[1], [0], [0], [1], [0, 0, 1, 1], [], []>} : vector<128x128xbf16>, vector<128x128xbf16>, vector<128x128xf32> -> vector<128x128xf32>
    %4 = arith.truncf %3 : vector<128x128xf32> to vector<128x128xbf16>
    %cst_5 = arith.constant dense<0.000000e+00> : vector<128x128xf32>
    %5 = tpu.matmul %0, %4, %cst_5 {dimension_numbers = #tpu.dot_dimension_numbers<[1], [0], [0], [1], [0, 0, 1, 1], [], []>} : vector<128x128xbf16>, vector<128x128xbf16>, vector<128x128xf32> -> vector<128x128xf32>
    %c0_6 = arith.constant 0 : index
    %c0_7 = arith.constant 0 : index
    %6 = vector.load %arg3[%c0_6, %c0_7] : memref<1x128xf32, #tpu.memory_space<vmem>>, vector<1x128xf32>
    %7 = vector.broadcast %6 : vector<1x128xf32> to vector<128x128xf32>
    %8 = arith.addf %5, %7 : vector<128x128xf32>
    %cst_8 = arith.constant 0.000000e+00 : f32
    %9 = vector.broadcast %cst_8 : f32 to vector<128x128xf32>
    %10 = arith.maximumf %8, %9 : vector<128x128xf32>
    %11 = arith.truncf %10 : vector<128x128xf32> to vector<128x128xbf16>
    %c0_9 = arith.constant 0 : index
    %c0_10 = arith.constant 0 : index
    %12 = vector.load %arg4[%c0_9, %c0_10] : memref<128x128xbf16, #tpu.memory_space<vmem>>, vector<128x128xbf16>
    %cst_11 = arith.constant dense<0.000000e+00> : vector<128x128xf32>
    %13 = tpu.matmul %11, %12, %cst_11 {dimension_numbers = #tpu.dot_dimension_numbers<[1], [0], [0], [1], [0, 0, 1, 1], [], []>} : vector<128x128xbf16>, vector<128x128xbf16>, vector<128x128xf32> -> vector<128x128xf32>
    %14 = arith.truncf %13 : vector<128x128xf32> to vector<128x128xbf16>
    %cst_12 = arith.constant dense<0.000000e+00> : vector<128x128xf32>
    %15 = tpu.matmul %0, %14, %cst_12 {dimension_numbers = #tpu.dot_dimension_numbers<[1], [0], [0], [1], [0, 0, 1, 1], [], []>} : vector<128x128xbf16>, vector<128x128xbf16>, vector<128x128xf32> -> vector<128x128xf32>
    %c0_13 = arith.constant 0 : index
    %c0_14 = arith.constant 0 : index
    %16 = vector.load %arg5[%c0_13, %c0_14] : memref<1x128xf32, #tpu.memory_space<vmem>>, vector<1x128xf32>
    %17 = vector.broadcast %16 : vector<1x128xf32> to vector<128x128xf32>
    %18 = arith.addf %15, %17 : vector<128x128xf32>
    %c0_15 = arith.constant 0 : index
    %c0_16 = arith.constant 0 : index
    %19 = vector.load %arg6[%c0_15, %c0_16] : memref<128x128xf32, #tpu.memory_space<vmem>>, vector<128x128xf32>
    tpu.vector_store %arg6[%c0_15, %c0_16], %18 {strides = array<i32>} : memref<128x128xf32, #tpu.memory_space<vmem>>, vector<128x128xf32>,
    return
  }
}

</mosaic_0001>

<bundles_post_ra>
// kernel: tpu_custom_call.1
= control target key start
LH: loop header
LB: loop body
LE: loop exit
PB: predicated region body
PF: predicated region fallthrough
CT: control target
= control target key end

     0   :  { %11 = vsyncpa [#allocation3], 0  ;;  %s1020_s0 = inlined_call_operand.hbm [shape: bf16[128,128], index: 0, kind: input, shape index: {}]   ;;  %s1021_s1 = inlined_call_operand.hbm [shape: bf16[128,128], index: 1, kind: input, shape index: {}]   ;;  %s1022_s2 = inlined_call_operand.hbm [shape: bf16[128,128], index: 2, kind: input, shape index: {}]   ;;  %s1023_s3 = inlined_call_operand.vmem [shape: f32[1,128], index: 3, kind: input, shape index: {}]   ;;  %s1024_s4 = inlined_call_operand.hbm [shape: bf16[128,128], index: 4, kind: input, shape index: {}]   ;;  %s1025_s5 = inlined_call_operand.vmem [shape: f32[1,128], index: 5, kind: input, shape index: {}]   ;;  %s1026_s6 = inlined_call_operand.hbm [shape: f32[128,128], index: 6, kind: output, shape index: {}]  }
   0x1   :  { %12 = vsyncpa [#allocation6], 0 }
   0x2   :  { %13 = vsyncpa [#allocation9], 0 }
   0x3   :  { %14 = vsyncpa [#allocation4], 0  ;;  %s32_s23 = sshll.u32 %s1021_s1, 4  ;;  %s923_s24 = smov [#allocation5]   ;;  %s33_s23 = int_to_ptr.hbm [resolvable:$true] %s32_s23 }
   0x4   :  { %s34_s25 = sshll.u32 %s923_s24, 4  ;;  %s19_s28 = sshll.u32 %s1020_s0, 4  ;;  %s35_s25 = int_to_ptr.vmem [resolvable:$true] %s34_s25  ;;  %s20_s28 = int_to_ptr.hbm [resolvable:$true] %s19_s28 }
   0x5   :  { %s924_s29 = smov 64   ;;  %s925_s30 = smov 4  }
   0x6   :  { %40 = dma.hbm_to_vmem [thread:$0]  %s33_s23, 1024, %s35_s25, [#allocation6], %s924_s29, %s924_s29, %s925_s30  }
   0x7   :  { %s926_s7 = smov [#allocation2]   ;;  %s45_s11 = sshll.u32 %s1022_s2, 4  ;;  %s46_s11 = int_to_ptr.hbm [resolvable:$true] %s45_s11 }
   0x8   :  { %s21_s8 = sshll.u32 %s926_s7, 4  ;;  %s60_s13 = sshll.u32 %s1024_s4, 4  ;;  %s22_s8 = int_to_ptr.vmem [resolvable:$true] %s21_s8  ;;  %s61_s13 = int_to_ptr.hbm [resolvable:$true] %s60_s13 }
   0x9   :  { %27 = dma.hbm_to_vmem [thread:$0]  %s20_s28, 1024, %s22_s8, [#allocation3], %s924_s29, %s924_s29, %s925_s30  }
   0xa   :  { %s927_s14 = smov [#allocation7]   ;;  %s928_s0 = smov [#allocation8]  }
   0xb   :  { %s47_s15 = sshll.u32 %s927_s14, 4  ;;  %s62_s16 = sshll.u32 %s928_s0, 4  ;;  %s48_s15 = int_to_ptr.vmem [resolvable:$true] %s47_s15  ;;  %s63_s16 = int_to_ptr.vmem [resolvable:$true] %s62_s16 }
   0xc   :  { %53 = dma.hbm_to_vmem [thread:$0]  %s46_s11, 1024, %s48_s15, [#allocation6], %s924_s29, %s924_s29, %s925_s30  }
   0xd   :  { %68 = dma.hbm_to_vmem [thread:$0]  %s61_s13, 1024, %s63_s16, [#allocation9], %s924_s29, %s924_s29, %s925_s30  }
   0xe   :  { %915 = dma.done.wait [#allocation3], 1024  }
   0xf   :  { %916 = vsyncadd [#allocation3], 4294966272 }
  0x10   :  { %917 = dma.done.wait [#allocation6], 2048  }
  0x11   :  { %918 = vsyncadd [#allocation6], 4294965248 }
  0x12   :  { %919 = dma.done.wait [#allocation9], 1024  }
  0x13   :  { %920 = vsyncadd [#allocation9], 4294966272  ;;  %v775_v0 = vld [vmem:[#allocation7 + $0x38] sm:$0xff]  ;;  %v774_v1 = vld [vmem:[#allocation7 + $0x30] sm:$0xff]  ;;  %s609_s21 = sshll.u32 %s1026_s6, 4  ;;  %s930_s22 = smov 128   ;;  %s610_s21 = int_to_ptr.hbm [resolvable:$true] %s609_s21 }
  0x14   :  { %231 = vmatpush.bf16.msra.mxu0 %v775_v0  ;;  %v773_v2 = vld [vmem:[#allocation7 + $0x28] sm:$0xff]  ;;  %v772_v3 = vld [vmem:[#allocation7 + $0x20] sm:$0xff]  ;;  %v771_v4 = vld [vmem:[#allocation7 + $0x18] sm:$0xff]  ;;  %s931_s23 = smov 8  }
  0x15   :  { %v770_v5 = vld [vmem:[#allocation7 + $0x10] sm:$0xff]  ;;  %v769_v6 = vld [vmem:[#allocation7 + $0x8] sm:$0xff]  ;;  %v768_v7 = vld [vmem:[#allocation7] sm:$0xff] }
  0x16   :  { %v760_v8 = vld [vmem:[#allocation2] sm:$0xff]  ;;  %v761_v9 = vld [vmem:[#allocation2 + $0x8] sm:$0xff]  ;;  %v762_v10 = vld [vmem:[#allocation2 + $0x10] sm:$0xff] }
  0x17   :  { %v763_v11 = vld [vmem:[#allocation2 + $0x18] sm:$0xff]  ;;  %v764_v12 = vld [vmem:[#allocation2 + $0x20] sm:$0xff]  ;;  %v765_v13 = vld [vmem:[#allocation2 + $0x28] sm:$0xff] }
  0x18   :  { %232 = vmatpush.bf16.msra.mxu0 %v774_v1  ;;  %v766_v14 = vld [vmem:[#allocation2 + $0x30] sm:$0xff]  ;;  %v767_v15 = vld [vmem:[#allocation2 + $0x38] sm:$0xff]  ;;  %v979_v40 = vld [vmem:[#allocation5] sm:$0xff] }
  0x19   :  { %v982_v41 = vld [vmem:[#allocation5 + $0x8] sm:$0xff]  ;;  %v985_v42 = vld [vmem:[#allocation5 + $0x10] sm:$0xff]  ;;  %v988_v43 = vld [vmem:[#allocation5 + $0x18] sm:$0xff] }
  0x1a   :  { %v991_v44 = vld [vmem:[#allocation5 + $0x20] sm:$0xff]  ;;  %v783_v45 = vld [vmem:[#allocation8 + $0x38] sm:$0xff]  ;;  %v994_v46 = vld [vmem:[#allocation5 + $0x28] sm:$0xff] }
  0x1b   :  { %477 = vmatpush.bf16.msra.mxu2 %v783_v45  ;;  %v782_v47 = vld [vmem:[#allocation8 + $0x30] sm:$0xff]  ;;  %v781_v48 = vld [vmem:[#allocation8 + $0x28] sm:$0xff]  ;;  %v780_v49 = vld [vmem:[#allocation8 + $0x20] sm:$0xff] }
  0x1c   :  { %233 = vmatpush.bf16.msra.mxu0 %v773_v2  ;;  %v779_v50 = vld [vmem:[#allocation8 + $0x18] sm:$0xff]  ;;  %v997_v51 = vld [vmem:[#allocation5 + $0x30] sm:$0xff]  ;;  %v777_v53 = vld [vmem:[#allocation8 + $0x8] sm:$0xff] }
  0x1d   :  { %v778_v52 = vld [vmem:[#allocation8 + $0x10] sm:$0xff]  ;;  %v776_v54 = vld [vmem:[#allocation8] sm:$0xff]  ;;  %v1000_v55 = vld [vmem:[#allocation5 + $0x38] sm:$0xff] }
  0x1e   :  { %v793_v57 = vld [vmem:[%s1023_s3] ss:$0 sm:$0xff] }
  0x1f   :  { %478 = vmatpush.bf16.msra.mxu2 %v782_v47 }
  0x20   :  { %234 = vmatpush.bf16.msra.mxu0 %v772_v3 }
  0x23   :  { %479 = vmatpush.bf16.msra.mxu2 %v781_v48 }
  0x24   :  { %235 = vmatpush.bf16.msra.mxu0 %v771_v4 }
  0x27   :  { %480 = vmatpush.bf16.msra.mxu2 %v780_v49 }
  0x28   :  { %236 = vmatpush.bf16.msra.mxu0 %v770_v5 }
  0x2b   :  { %481 = vmatpush.bf16.msra.mxu2 %v779_v50 }
  0x2c   :  { %237 = vmatpush.bf16.msra.mxu0 %v769_v6 }
  0x2f   :  { %482 = vmatpush.bf16.msra.mxu2 %v778_v52 }
  0x30   :  { %238 = vmatpush.bf16.msra.mxu0 %v768_v7 }
  0x33   :  { %239 = vmatmul.bf16.vlgmr.msra.gmra.mxu0 %v760_v8  ;;  %483 = vmatpush.bf16.msra.mxu2 %v777_v53 }
  0x37   :  { %484 = vmatpush.bf16.msra.mxu2 %v776_v54 }
  0x43   :  { %244 = vmatmul.bf16.gmra.mxu0 %v761_v9 }
  0x53   :  { %249 = vmatmul.bf16.gmra.mxu0 %v762_v10 }
  0x63   :  { %254 = vmatmul.bf16.gmra.mxu0 %v763_v11 }
  0x73   :  { %259 = vmatmul.bf16.gmra.mxu0 %v764_v12 }
  0x83   :  { %264 = vmatmul.bf16.gmra.mxu0 %v765_v13 }
  0x93   :  { %269 = vmatmul.bf16.gmra.mxu0 %v766_v14 }
  0xa3   :  { %274 = vmatmul.bf16.gmra.mxu0 %v767_v15 }
  0xb0   :  { %v240_v16 = vpop.f32.mrf.mxu0 }
  0xb8   :  { %v242_v17 = vpop.f32.mrf.mxu0 }
  0xb9   :  { %v280_v18 = vpack.c.bf16 %v242_v17, %v240_v16 }
  0xc0   :  { %v245_v19 = vpop.f32.mrf.mxu0 }
  0xc8   :  { %v247_v20 = vpop.f32.mrf.mxu0 }
  0xc9   :  { %v281_v21 = vpack.c.bf16 %v247_v20, %v245_v19 }
  0xd0   :  { %v250_v22 = vpop.f32.mrf.mxu0 }
  0xd8   :  { %v252_v23 = vpop.f32.mrf.mxu0 }
  0xd9   :  { %v282_v24 = vpack.c.bf16 %v252_v23, %v250_v22 }
  0xe0   :  { %v255_v25 = vpop.f32.mrf.mxu0 }
  0xe8   :  { %v257_v26 = vpop.f32.mrf.mxu0 }
  0xe9   :  { %v283_v27 = vpack.c.bf16 %v257_v26, %v255_v25 }
  0xf0   :  { %v260_v28 = vpop.f32.mrf.mxu0 }
  0xf8   :  { %v262_v29 = vpop.f32.mrf.mxu0 }
  0xf9   :  { %v284_v39 = vpack.c.bf16 %v262_v29, %v260_v28 }
 0x100   :  { %v265_v30 = vpop.f32.mrf.mxu0 }
 0x108   :  { %v267_v31 = vpop.f32.mrf.mxu0 }
 0x109   :  { %v285_v38 = vpack.c.bf16 %v267_v31, %v265_v30 }
 0x110   :  { %v270_v32 = vpop.f32.mrf.mxu0 }
 0x118   :  { %v272_v33 = vpop.f32.mrf.mxu0 }
 0x119   :  { %v286_v37 = vpack.c.bf16 %v272_v33, %v270_v32 }
 0x120   :  { %v275_v34 = vpop.f32.mrf.mxu0 }
 0x128   :  { %v277_v35 = vpop.f32.mrf.mxu0 }
 0x129   :  { %v287_v36 = vpack.c.bf16 %v277_v35, %v275_v34 }
 0x12b   :  { %340 = vmatpush.bf16.msra.mxu1 %v287_v36 }
 0x12f   :  { %341 = vmatpush.bf16.msra.mxu1 %v286_v37 }
 0x133   :  { %342 = vmatpush.bf16.msra.mxu1 %v285_v38 }
 0x137   :  { %343 = vmatpush.bf16.msra.mxu1 %v284_v39 }
 0x13b   :  { %344 = vmatpush.bf16.msra.mxu1 %v283_v27 }
 0x13f   :  { %345 = vmatpush.bf16.msra.mxu1 %v282_v24 }
 0x143   :  { %346 = vmatpush.bf16.msra.mxu1 %v281_v21 }
 0x147   :  { %347 = vmatpush.bf16.msra.mxu1 %v280_v18 }
 0x14a   :  { %348 = vmatmul.bf16.vlgmr.msra.gmra.mxu1 %v979_v40 }
 0x15a   :  { %353 = vmatmul.bf16.gmra.mxu1 %v982_v41 }
 0x16a   :  { %358 = vmatmul.bf16.gmra.mxu1 %v985_v42 }
 0x17a   :  { %363 = vmatmul.bf16.gmra.mxu1 %v988_v43 }
 0x18a   :  { %368 = vmatmul.bf16.gmra.mxu1 %v991_v44 }
 0x19a   :  { %373 = vmatmul.bf16.gmra.mxu1 %v994_v46 }
 0x1aa   :  { %378 = vmatmul.bf16.gmra.mxu1 %v997_v51 }
 0x1ba   :  { %383 = vmatmul.bf16.gmra.mxu1 %v1000_v55 }
 0x1c7   :  { %v349_v56 = vpop.f32.mrf.mxu1 }
 0x1c8   :  { %v350_v58 = vadd.f32 %v793_v57, %v349_v56 }
 0x1ca   :  { %v389_v61 = vmax.f32 %v350_v58, 0.0 }
 0x1cf   :  { %v351_v59 = vpop.f32.mrf.mxu1 }
 0x1d0   :  { %v352_v60 = vadd.f32 %v793_v57, %v351_v59 }
 0x1d2   :  { %v390_v62 = vmax.f32 %v352_v60, 0.0 }
 0x1d4   :  { %v405_v63 = vpack.c.bf16 %v390_v62, %v389_v61 }
 0x1d6   :  { %485 = vmatmul.bf16.vlgmr.msra.gmra.mxu2 %v405_v63 }
 0x1d7   :  { %v354_v0 = vpop.f32.mrf.mxu1 }
 0x1d8   :  { %v355_v1 = vadd.f32 %v793_v57, %v354_v0 }
 0x1da   :  { %v391_v4 = vmax.f32 %v355_v1, 0.0 }
 0x1df   :  { %v356_v2 = vpop.f32.mrf.mxu1 }
 0x1e0   :  { %v357_v3 = vadd.f32 %v793_v57, %v356_v2 }
 0x1e2   :  { %v392_v5 = vmax.f32 %v357_v3, 0.0 }
 0x1e4   :  { %v406_v6 = vpack.c.bf16 %v392_v5, %v391_v4 }
 0x1e6   :  { %490 = vmatmul.bf16.gmra.mxu2 %v406_v6 }
 0x1e7   :  { %v359_v7 = vpop.f32.mrf.mxu1 }
 0x1e8   :  { %v360_v8 = vadd.f32 %v793_v57, %v359_v7 }
 0x1ea   :  { %v393_v11 = vmax.f32 %v360_v8, 0.0 }
 0x1ef   :  { %v361_v9 = vpop.f32.mrf.mxu1 }
 0x1f0   :  { %v362_v10 = vadd.f32 %v793_v57, %v361_v9 }
 0x1f2   :  { %v394_v12 = vmax.f32 %v362_v10, 0.0 }
 0x1f4   :  { %v407_v13 = vpack.c.bf16 %v394_v12, %v393_v11 }
 0x1f6   :  { %495 = vmatmul.bf16.gmra.mxu2 %v407_v13 }
 0x1f7   :  { %v364_v14 = vpop.f32.mrf.mxu1 }
 0x1f8   :  { %v365_v15 = vadd.f32 %v793_v57, %v364_v14 }
 0x1fa   :  { %v395_v18 = vmax.f32 %v365_v15, 0.0 }
 0x1ff   :  { %v366_v16 = vpop.f32.mrf.mxu1 }
 0x200   :  { %v367_v17 = vadd.f32 %v793_v57, %v366_v16 }
 0x202   :  { %v396_v19 = vmax.f32 %v367_v17, 0.0  ;;  %v794_v17 = vld [vmem:[%s1025_s5] ss:$0 sm:$0xff]  ;;  %s929_s5 = smov [#allocation10]  }
 0x203   :  { %s607_s18 = sshll.u32 %s929_s5, 4  ;;  %s608_s18 = int_to_ptr.vmem [resolvable:$true] %s607_s18 }
 0x204   :  { %v408_v20 = vpack.c.bf16 %v396_v19, %v395_v18 }
 0x206   :  { %500 = vmatmul.bf16.gmra.mxu2 %v408_v20 }
 0x207   :  { %v369_v21 = vpop.f32.mrf.mxu1 }
 0x208   :  { %v370_v22 = vadd.f32 %v793_v57, %v369_v21 }
 0x20a   :  { %v397_v25 = vmax.f32 %v370_v22, 0.0 }
 0x20f   :  { %v371_v23 = vpop.f32.mrf.mxu1 }
 0x210   :  { %v372_v24 = vadd.f32 %v793_v57, %v371_v23 }
 0x212   :  { %v398_v26 = vmax.f32 %v372_v24, 0.0 }
 0x214   :  { %v409_v27 = vpack.c.bf16 %v398_v26, %v397_v25 }
 0x216   :  { %505 = vmatmul.bf16.gmra.mxu2 %v409_v27 }
 0x217   :  { %v374_v28 = vpop.f32.mrf.mxu1 }
 0x218   :  { %v375_v29 = vadd.f32 %v793_v57, %v374_v28 }
 0x21a   :  { %v399_v32 = vmax.f32 %v375_v29, 0.0 }
 0x21f   :  { %v376_v30 = vpop.f32.mrf.mxu1 }
 0x220   :  { %v377_v31 = vadd.f32 %v793_v57, %v376_v30 }
 0x222   :  { %v400_v33 = vmax.f32 %v377_v31, 0.0 }
 0x224   :  { %v410_v34 = vpack.c.bf16 %v400_v33, %v399_v32 }
 0x226   :  { %510 = vmatmul.bf16.gmra.mxu2 %v410_v34 }
 0x227   :  { %v379_v35 = vpop.f32.mrf.mxu1 }
 0x228   :  { %v380_v36 = vadd.f32 %v793_v57, %v379_v35 }
 0x22a   :  { %v401_v39 = vmax.f32 %v380_v36, 0.0 }
 0x22f   :  { %v381_v37 = vpop.f32.mrf.mxu1 }
 0x230   :  { %v382_v38 = vadd.f32 %v793_v57, %v381_v37 }
 0x232   :  { %v402_v45 = vmax.f32 %v382_v38, 0.0 }
 0x234   :  { %v411_v47 = vpack.c.bf16 %v402_v45, %v401_v39 }
 0x236   :  { %515 = vmatmul.bf16.gmra.mxu2 %v411_v47 }
 0x237   :  { %v384_v48 = vpop.f32.mrf.mxu1 }
 0x238   :  { %v385_v49 = vadd.f32 %v793_v57, %v384_v48 }
 0x23a   :  { %v403_v53 = vmax.f32 %v385_v49, 0.0 }
 0x23f   :  { %v386_v50 = vpop.f32.mrf.mxu1 }
 0x240   :  { %v387_v52 = vadd.f32 %v793_v57, %v386_v50 }
 0x242   :  { %v404_v54 = vmax.f32 %v387_v52, 0.0 }
 0x244   :  { %v412_v56 = vpack.c.bf16 %v404_v54, %v403_v53 }
 0x246   :  { %520 = vmatmul.bf16.gmra.mxu2 %v412_v56 }
 0x259   :  { %v486_v58 = vpop.f32.mrf.mxu2 }
 0x261   :  { %v488_v59 = vpop.f32.mrf.mxu2 }
 0x262   :  { %v526_v60 = vpack.c.bf16 %v488_v59, %v486_v58 }
 0x269   :  { %v491_v61 = vpop.f32.mrf.mxu2 }
 0x271   :  { %v493_v62 = vpop.f32.mrf.mxu2 }
 0x272   :  { %v527_v63 = vpack.c.bf16 %v493_v62, %v491_v61 }
 0x279   :  { %v496_v0 = vpop.f32.mrf.mxu2 }
 0x281   :  { %v498_v1 = vpop.f32.mrf.mxu2 }
 0x282   :  { %v528_v2 = vpack.c.bf16 %v498_v1, %v496_v0 }
 0x289   :  { %v501_v3 = vpop.f32.mrf.mxu2 }
 0x291   :  { %v503_v4 = vpop.f32.mrf.mxu2 }
 0x292   :  { %v529_v5 = vpack.c.bf16 %v503_v4, %v501_v3 }
 0x299   :  { %v506_v6 = vpop.f32.mrf.mxu2 }
 0x2a1   :  { %v508_v7 = vpop.f32.mrf.mxu2 }
 0x2a2   :  { %v530_v16 = vpack.c.bf16 %v508_v7, %v506_v6 }
 0x2a9   :  { %v511_v8 = vpop.f32.mrf.mxu2 }
 0x2b1   :  { %v513_v57 = vpop.f32.mrf.mxu2 }
 0x2b2   :  { %v531_v15 = vpack.c.bf16 %v513_v57, %v511_v8 }
 0x2b9   :  { %v516_v9 = vpop.f32.mrf.mxu2 }
 0x2c1   :  { %v518_v10 = vpop.f32.mrf.mxu2 }
 0x2c2   :  { %v532_v14 = vpack.c.bf16 %v518_v10, %v516_v9 }
 0x2c9   :  { %v521_v11 = vpop.f32.mrf.mxu2 }
 0x2d1   :  { %v523_v12 = vpop.f32.mrf.mxu2 }
 0x2d2   :  { %v533_v13 = vpack.c.bf16 %v523_v12, %v521_v11 }
 0x2d4   :  { %538 = vmatpush.bf16.msra.mxu3 %v533_v13 }
 0x2d8   :  { %539 = vmatpush.bf16.msra.mxu3 %v532_v14 }
 0x2dc   :  { %540 = vmatpush.bf16.msra.mxu3 %v531_v15 }
 0x2e0   :  { %541 = vmatpush.bf16.msra.mxu3 %v530_v16 }
 0x2e4   :  { %542 = vmatpush.bf16.msra.mxu3 %v529_v5 }
 0x2e8   :  { %543 = vmatpush.bf16.msra.mxu3 %v528_v2 }
 0x2ec   :  { %544 = vmatpush.bf16.msra.mxu3 %v527_v63 }
 0x2f0   :  { %545 = vmatpush.bf16.msra.mxu3 %v526_v60 }
 0x2f3   :  { %546 = vmatmul.bf16.vlgmr.msra.gmra.mxu3 %v979_v40 }
 0x303   :  { %551 = vmatmul.bf16.gmra.mxu3 %v982_v41 }
 0x313   :  { %556 = vmatmul.bf16.gmra.mxu3 %v985_v42 }
 0x323   :  { %561 = vmatmul.bf16.gmra.mxu3 %v988_v43 }
 0x333   :  { %566 = vmatmul.bf16.gmra.mxu3 %v991_v44 }
 0x343   :  { %571 = vmatmul.bf16.gmra.mxu3 %v994_v46 }
 0x353   :  { %576 = vmatmul.bf16.gmra.mxu3 %v997_v51 }
 0x363   :  { %581 = vmatmul.bf16.gmra.mxu3 %v1000_v55 }
 0x376   :  { %v547_v18 = vpop.f32.mrf.mxu3 }
 0x377   :  { %v548_v40 = vadd.f32 %v794_v17, %v547_v18 }
 0x379   :  { %587 = vst [vmem:[#allocation10] sm:$0xff] %v548_v40 }
 0x37e   :  { %v549_v41 = vpop.f32.mrf.mxu3 }
 0x37f   :  { %v550_v19 = vadd.f32 %v794_v17, %v549_v41 }
 0x381   :  { %588 = vst [vmem:[#allocation10 + $0x8] sm:$0xff] %v550_v19 }
 0x386   :  { %v552_v42 = vpop.f32.mrf.mxu3 }
 0x387   :  { %v553_v43 = vadd.f32 %v794_v17, %v552_v42 }
 0x389   :  { %589 = vst [vmem:[#allocation10 + $0x10] sm:$0xff] %v553_v43 }
 0x38e   :  { %v554_v44 = vpop.f32.mrf.mxu3 }
 0x38f   :  { %v555_v20 = vadd.f32 %v794_v17, %v554_v44 }
 0x391   :  { %590 = vst [vmem:[#allocation10 + $0x18] sm:$0xff] %v555_v20 }
 0x396   :  { %v557_v46 = vpop.f32.mrf.mxu3 }
 0x397   :  { %v558_v51 = vadd.f32 %v794_v17, %v557_v46 }
 0x399   :  { %591 = vst [vmem:[#allocation10 + $0x20] sm:$0xff] %v558_v51 }
 0x39e   :  { %v559_v55 = vpop.f32.mrf.mxu3 }
 0x39f   :  { %v560_v21 = vadd.f32 %v794_v17, %v559_v55 }
 0x3a1   :  { %592 = vst [vmem:[#allocation10 + $0x28] sm:$0xff] %v560_v21 }
 0x3a6   :  { %v562_v22 = vpop.f32.mrf.mxu3 }
 0x3a7   :  { %v563_v23 = vadd.f32 %v794_v17, %v562_v22 }
 0x3a9   :  { %593 = vst [vmem:[#allocation10 + $0x30] sm:$0xff] %v563_v23 }
 0x3ae   :  { %v564_v24 = vpop.f32.mrf.mxu3 }
 0x3af   :  { %v565_v25 = vadd.f32 %v794_v17, %v564_v24 }
 0x3b1   :  { %594 = vst [vmem:[#allocation10 + $0x38] sm:$0xff] %v565_v25 }
 0x3b6   :  { %v567_v26 = vpop.f32.mrf.mxu3 }
 0x3b7   :  { %v568_v27 = vadd.f32 %v794_v17, %v567_v26 }
 0x3b9   :  { %595 = vst [vmem:[#allocation10 + $0x40] sm:$0xff] %v568_v27 }
 0x3be   :  { %v569_v28 = vpop.f32.mrf.mxu3 }
 0x3bf   :  { %v570_v29 = vadd.f32 %v794_v17, %v569_v28 }
 0x3c1   :  { %596 = vst [vmem:[#allocation10 + $0x48] sm:$0xff] %v570_v29 }
 0x3c6   :  { %v572_v30 = vpop.f32.mrf.mxu3 }
 0x3c7   :  { %v573_v31 = vadd.f32 %v794_v17, %v572_v30 }
 0x3c9   :  { %597 = vst [vmem:[#allocation10 + $0x50] sm:$0xff] %v573_v31 }
 0x3ce   :  { %v574_v32 = vpop.f32.mrf.mxu3 }
 0x3cf   :  { %v575_v33 = vadd.f32 %v794_v17, %v574_v32 }
 0x3d1   :  { %598 = vst [vmem:[#allocation10 + $0x58] sm:$0xff] %v575_v33 }
 0x3d6   :  { %v577_v34 = vpop.f32.mrf.mxu3 }
 0x3d7   :  { %v578_v35 = vadd.f32 %v794_v17, %v577_v34 }
 0x3d9   :  { %599 = vst [vmem:[#allocation10 + $0x60] sm:$0xff] %v578_v35 }
 0x3de   :  { %v579_v36 = vpop.f32.mrf.mxu3 }
 0x3df   :  { %v580_v37 = vadd.f32 %v794_v17, %v579_v36 }
 0x3e1   :  { %600 = vst [vmem:[#allocation10 + $0x68] sm:$0xff] %v580_v37 }
 0x3e6   :  { %v582_v38 = vpop.f32.mrf.mxu3 }
 0x3e7   :  { %v583_v39 = vadd.f32 %v794_v17, %v582_v38 }
 0x3e9   :  { %601 = vst [vmem:[#allocation10 + $0x70] sm:$0xff] %v583_v39 }
 0x3ee   :  { %v584_v45 = vpop.f32.mrf.mxu3 }
 0x3ef   :  { %v585_v47 = vadd.f32 %v794_v17, %v584_v45 }
 0x3f1   :  { %602 = vst [vmem:[#allocation10 + $0x78] sm:$0xff] %v585_v47 }
 0x3f2   :  { %615 = dma.vmem_to_hbm [thread:$0]  %s608_s18, 2048, %s610_s21, [#allocation4], %s930_s22, %s930_s22, %s931_s23  }
 0x3f3   :  { %921 = dma.done.wait [#allocation4], 2048  }
 0x3f4   :  { %922 = vsyncadd [#allocation4], 4294965248 }
 0x3f5   :  { %620 = vsyncpa [#allocation3], 1 }
 0x3f6   :  { %621 = vsyncpa [#allocation6], 1 }
 0x3f7   :  { %622 = vsyncpa [#allocation9], 1 }
 0x3f8   :  { %623 = vsyncpa [#allocation4], 1 }

</bundles_post_ra>
